<compile_context>
chip_gen: v5e
topology: v5e:2x2
jax: 0.10.0
libtpu: 0.0.40
codegen_flags: <defaults>
</compile_context>

<pallas_src>
import numpy as np
import jax
import jax.numpy as jnp
from jax.experimental import pallas as pl
from jax.experimental.pallas import tpu as pltpu

EPS = 1e-5
_VMEM_LIMIT = 48 * 1024 * 1024        # safe on v5e/v6e (128 MiB) and v7x (64 MiB)
_X_BLOCK_BUDGET = 4 << 20             # ~4 MiB x-block (review: 2-6 MiB sweet spot)
_MAX_TILE_LANES = 4096                # bounds static unroll (<=32 chunks of 128)


# ----------------------------- Pallas kernels ------------------------------ #

def _make_stats_kernel(n_chunks, chunk_w):
    """Per-batch per-channel (sum, sumsq) over HW tiles.

    Inner loop: only lane-aligned VPU adds into (C, chunk_w) VMEM scratch.
    Cross-lane reduce + narrow (C,1) stores happen once per batch (j == last).
    """
    def kernel(x_ref, ps_ref, acc1, acc2):
        j = pl.program_id(1)

        @pl.when(j == 0)
        def _init():
            acc1[...] = jnp.zeros_like(acc1)
            acc2[...] = jnp.zeros_like(acc2)

        for k in range(n_chunks):                      # static, <=32 iterations
            lo = k * chunk_w
            c = x_ref[0, :, lo:lo + chunk_w].astype(jnp.float32)   # (C, chunk_w)
            acc1[...] += c
            acc2[...] += c * c

        @pl.when(j == pl.num_programs(1) - 1)
        def _finalize():
            ps_ref[0, :, 0:1] = jnp.sum(acc1[...], axis=1, keepdims=True)
            ps_ref[0, :, 1:2] = jnp.sum(acc2[...], axis=1, keepdims=True)

    return kernel


def _make_epilogue_kernel(inv_count, eps):
    """Fuse: combine per-batch partial stats -> (mean, invstd), run both
    conditional linears, and emit scale/shift per (channel, batch)."""
    def kernel(ps_ref, yT_ref, wg_ref, bg_ref, wb_ref, bb_ref, ss_ref):
        totals = jnp.sum(ps_ref[...], axis=0)              # (C, 2) f32
        mean = totals[:, 0:1] * inv_count                  # (C, 1)
        var = totals[:, 1:2] * inv_count - mean * mean     # biased variance
        var = jnp.maximum(var, 0.0)                        # guard E[x^2]-E[x]^2 < 0
        invstd = jax.lax.rsqrt(var + eps)                  # (C, 1)

        yT = yT_ref[...].astype(jnp.float32)               # (K, B)
        gain = 1.0 + (jnp.dot(wg_ref[...].astype(jnp.float32), yT,
                              preferred_element_type=jnp.float32)
                      + bg_ref[...].astype(jnp.float32))   # (C, B)
        bias = (jnp.dot(wb_ref[...].astype(jnp.float32), yT,
                        preferred_element_type=jnp.float32)
                + bb_ref[...].astype(jnp.float32))         # (C, B)

        scale = invstd * gain                              # (C, B)
        shift = mean * scale - bias                        # (C, B)
        ss_ref[0] = scale
        ss_ref[1] = shift

    return kernel


def _make_apply_kernel(n_chunks, chunk_w):
    """out = x * scale - shift, chunked in 128-lane slices."""
    def kernel(x_ref, ss_ref, o_ref):
        scale = ss_ref[0, 0]                               # (C, 1) f32
        shift = ss_ref[0, 1]                               # (C, 1) f32
        for k in range(n_chunks):                          # static, <=32 iterations
            lo = k * chunk_w
            xk = x_ref[0, :, lo:lo + chunk_w].astype(jnp.float32)
            o_ref[0, :, lo:lo + chunk_w] = (xk * scale - shift).astype(o_ref.dtype)

    return kernel


# ------------------------------ call helpers ------------------------------- #

def _full_spec(shape):
    n = len(shape)
    return pl.BlockSpec(shape, lambda *_: (0,) * n)


def _pick_tile(C, HW, itemsize,
               budget_bytes=_X_BLOCK_BUDGET, max_lanes=_MAX_TILE_LANES):
    """Spatial tile: largest multiple of 128 dividing HW with C*tile*itemsize
    under the byte budget (and <= max_lanes). Returns (tile, chunk_w)."""
    if HW % 128 != 0:
        # Full-extent fallback (legal: block == array extent).  See TODO above.
        return HW, HW
    best = 128
    t = 256
    cap = min(HW, max_lanes)
    while t <= cap:
        if HW % t == 0 and C * t * itemsize <= budget_bytes:
            best = t
        t += 128
    return best, 128


# ------------------------------ ccbn forward ------------------------------- #

def ccbn_forward(x_nchw, y, params, eps=EPS):
    """ccbn.forward(x, y) for the default 'bn' branch in training mode."""
    B, C, H, W = x_nchw.shape
    K = y.shape[1]
    HW = H * W
    x3 = x_nchw.reshape(B, C, HW)                 # metadata-only NCHW view

    tile, chunk_w = _pick_tile(C, HW, jnp.dtype(x_nchw.dtype).itemsize)
    n_chunks = tile // chunk_w
    grid = (B, HW // tile)

    # ---- Pass 1: per-batch per-channel (sum, sumsq) ------------------------ #
    partial = pl.pallas_call(
        _make_stats_kernel(n_chunks, chunk_w),
        grid=grid,
        in_specs=[pl.BlockSpec((1, C, tile), lambda b, j: (b, 0, j))],
        out_specs=pl.BlockSpec((1, C, 2), lambda b, j: (b, 0, 0)),
        out_shape=jax.ShapeDtypeStruct((B, C, 2), jnp.float32),
        scratch_shapes=[pltpu.VMEM((C, chunk_w), jnp.float32),
                        pltpu.VMEM((C, chunk_w), jnp.float32)],
        compiler_params=pltpu.CompilerParams(
            dimension_semantics=("parallel", "arbitrary"),
            vmem_limit_bytes=_VMEM_LIMIT),
    )(x3)

    # ---- Epilogue: finalize stats + conditional linears -> scale/shift ----- #
    y_t = jnp.transpose(y)                        # (K, B) tiny, outside kernel
    bg = params["bg"].reshape(C, 1)
    bb = params["bb"].reshape(C, 1)
    ss = pl.pallas_call(
        _make_epilogue_kernel(1.0 / float(B * HW), eps),
        grid=(1,),
        in_specs=[_full_spec((B, C, 2)), _full_spec((K, B)),
                  _full_spec((C, K)), _full_spec((C, 1)),
                  _full_spec((C, K)), _full_spec((C, 1))],
        out_specs=_full_spec((2, C, B)),
        out_shape=jax.ShapeDtypeStruct((2, C, B), jnp.float32),
        compiler_params=pltpu.CompilerParams(
            dimension_semantics=("arbitrary",)),
    )(partial, y_t, params["wg"], bg, params["wb"], bb)

    # Tiny layout plumbing outside kernels: (2, C, B) -> (B, 2, C, 1).
    ss_b = jnp.transpose(ss, (2, 0, 1))[:, :, :, None]

    # ---- Pass 2: normalize + conditional affine, fully parallel ------------ #
    out3 = pl.pallas_call(
        _make_apply_kernel(n_chunks, chunk_w),
        grid=grid,
        in_specs=[pl.BlockSpec((1, C, tile), lambda b, j: (b, 0, j)),      # x
                  pl.BlockSpec((1, 2, C, 1), lambda b, j: (b, 0, 0, 0))],  # scale/shift
        out_specs=pl.BlockSpec((1, C, tile), lambda b, j: (b, 0, j)),
        out_shape=jax.ShapeDtypeStruct((B, C, HW), x_nchw.dtype),
        compiler_params=pltpu.CompilerParams(
            dimension_semantics=("parallel", "parallel"),
            vmem_limit_bytes=_VMEM_LIMIT),
    )(x3, ss_b)

    return out3.reshape(B, C, H, W)


# --------------------------- pure-JAX reference ----------------------------- #

def ccbn_reference(x, y, p, eps=EPS):
    gain = 1.0 + (y @ p["wg"].T + p["bg"])           # (B, C)
    bias = y @ p["wb"].T + p["bb"]                   # (B, C)
    m = jnp.mean(x, axis=(0, 2, 3), keepdims=True)
    v = jnp.mean(x * x, axis=(0, 2, 3), keepdims=True) - m * m
    xhat = (x - m) * jax.lax.rsqrt(v + eps)
    return xhat * gain[:, :, None, None] + bias[:, :, None, None]


# ----------------------------------- main ----------------------------------- #

if __name__ == "__main__":
    B, C, K, H, W = 2, 32, 16, 16, 16                # output_size=32, input_size=16
    key = jax.random.PRNGKey(0)
    ks = jax.random.split(key, 6)

    x = jax.random.normal(ks[0], (B, C, H, W), jnp.float32)
    y = jax.random.normal(ks[1], (B, K), jnp.float32)
    params = dict(
        wg=0.1 * jax.random.normal(ks[2], (C, K), jnp.float32),
        bg=0.1 * jax.random.normal(ks[3], (C,), jnp.float32),
        wb=0.1 * jax.random.normal(ks[4], (C, K), jnp.float32),
        bb=0.1 * jax.random.normal(ks[5], (C,), jnp.float32),
    )

    out = jax.block_until_ready(ccbn_forward(x, y, params))
    ref = jax.block_until_ready(ccbn_reference(x, y, params))

    assert out.shape == (B, C, H, W) and out.dtype == jnp.float32
    np.testing.assert_allclose(np.asarray(out), np.asarray(ref),
                               rtol=1e-3, atol=1e-3)
    print("KERNEL_OK")
</pallas_src>

<mosaic_0001>
module attributes {stable_mosaic.version = 11 : i64} {
  func.func @kernel(%arg0: i32, %arg1: i32, %arg2: memref<1x32x256xf32, #tpu.memory_space<vmem>>, %arg3: memref<1x32x2xf32, #tpu.memory_space<vmem>>, %arg4: memref<32x128xf32, #tpu.memory_space<vmem>>, %arg5: memref<32x128xf32, #tpu.memory_space<vmem>>) attributes {dimension_semantics = [#tpu.dimension_semantics<parallel>, #tpu.dimension_semantics<arbitrary>], iteration_bounds = array<i64: 2, 1>, scalar_prefetch = 0 : i64, scratch_operands = 2 : i64, tpu.core_type = #tpu.core_type<tc>, window_params = [{transform_indices = @transform_0, window_bounds = array<i64: 1, 32, 256>}, {transform_indices = @transform_1, window_bounds = array<i64: 1, 32, 2>}]} {
    %c0_i32 = arith.constant 0 : i32
    %0 = arith.cmpi eq, %arg1, %c0_i32 : i32
    %1 = arith.extui %0 : i1 to i32
    %c0_i32_0 = arith.constant 0 : i32
    %2 = arith.cmpi ne, %1, %c0_i32_0 : i32
    scf.if %2 {
      %cst = arith.constant 0.000000e+00 : f32
      %24 = vector.broadcast %cst : f32 to vector<32x128xf32>
      %c0_23 = arith.constant 0 : index
      %c0_24 = arith.constant 0 : index
      %25 = vector.load %arg4[%c0_23, %c0_24] : memref<32x128xf32, #tpu.memory_space<vmem>>, vector<32x128xf32>
      tpu.vector_store %arg4[%c0_23, %c0_24], %24 {strides = array<i32>} : memref<32x128xf32, #tpu.memory_space<vmem>>, vector<32x128xf32>,
      %cst_25 = arith.constant 0.000000e+00 : f32
      %26 = vector.broadcast %cst_25 : f32 to vector<32x128xf32>
      %c0_26 = arith.constant 0 : index
      %c0_27 = arith.constant 0 : index
      %27 = vector.load %arg5[%c0_26, %c0_27] : memref<32x128xf32, #tpu.memory_space<vmem>>, vector<32x128xf32>
      tpu.vector_store %arg5[%c0_26, %c0_27], %26 {strides = array<i32>} : memref<32x128xf32, #tpu.memory_space<vmem>>, vector<32x128xf32>,
    } else {
    }
    %c0 = arith.constant 0 : index
    %c0_1 = arith.constant 0 : index
    %c0_2 = arith.constant 0 : index
    %3 = vector.load %arg2[%c0, %c0_1, %c0_2] : memref<1x32x256xf32, #tpu.memory_space<vmem>>, vector<1x32x128xf32>
    %4 = vector.shape_cast %3 : vector<1x32x128xf32> to vector<32x128xf32>
    %c0_3 = arith.constant 0 : index
    %c0_4 = arith.constant 0 : index
    %5 = vector.load %arg4[%c0_3, %c0_4] : memref<32x128xf32, #tpu.memory_space<vmem>>, vector<32x128xf32>
    %6 = arith.addf %5, %4 : vector<32x128xf32>
    %c0_5 = arith.constant 0 : index
    %c0_6 = arith.constant 0 : index
    %7 = vector.load %arg4[%c0_5, %c0_6] : memref<32x128xf32, #tpu.memory_space<vmem>>, vector<32x128xf32>
    tpu.vector_store %arg4[%c0_5, %c0_6], %6 {strides = array<i32>} : memref<32x128xf32, #tpu.memory_space<vmem>>, vector<32x128xf32>,
    %c0_7 = arith.constant 0 : index
    %c0_8 = arith.constant 0 : index
    %8 = vector.load %arg5[%c0_7, %c0_8] : memref<32x128xf32, #tpu.memory_space<vmem>>, vector<32x128xf32>
    %9 = arith.mulf %4, %4 : vector<32x128xf32>
    %10 = arith.addf %8, %9 : vector<32x128xf32>
    %c0_9 = arith.constant 0 : index
    %c0_10 = arith.constant 0 : index
    %11 = vector.load %arg5[%c0_9, %c0_10] : memref<32x128xf32, #tpu.memory_space<vmem>>, vector<32x128xf32>
    tpu.vector_store %arg5[%c0_9, %c0_10], %10 {strides = array<i32>} : memref<32x128xf32, #tpu.memory_space<vmem>>, vector<32x128xf32>,
    %c0_11 = arith.constant 0 : index
    %c0_12 = arith.constant 0 : index
    %c128 = arith.constant 128 : index
    %12 = vector.load %arg2[%c0_11, %c0_12, %c128] : memref<1x32x256xf32, #tpu.memory_space<vmem>>, vector<1x32x128xf32>
    %13 = vector.shape_cast %12 : vector<1x32x128xf32> to vector<32x128xf32>
    %c0_13 = arith.constant 0 : index
    %c0_14 = arith.constant 0 : index
    %14 = vector.load %arg4[%c0_13, %c0_14] : memref<32x128xf32, #tpu.memory_space<vmem>>, vector<32x128xf32>
    %15 = arith.addf %14, %13 : vector<32x128xf32>
    %c0_15 = arith.constant 0 : index
    %c0_16 = arith.constant 0 : index
    %16 = vector.load %arg4[%c0_15, %c0_16] : memref<32x128xf32, #tpu.memory_space<vmem>>, vector<32x128xf32>
    tpu.vector_store %arg4[%c0_15, %c0_16], %15 {strides = array<i32>} : memref<32x128xf32, #tpu.memory_space<vmem>>, vector<32x128xf32>,
    %c0_17 = arith.constant 0 : index
    %c0_18 = arith.constant 0 : index
    %17 = vector.load %arg5[%c0_17, %c0_18] : memref<32x128xf32, #tpu.memory_space<vmem>>, vector<32x128xf32>
    %18 = arith.mulf %13, %13 : vector<32x128xf32>
    %19 = arith.addf %17, %18 : vector<32x128xf32>
    %c0_19 = arith.constant 0 : index
    %c0_20 = arith.constant 0 : index
    %20 = vector.load %arg5[%c0_19, %c0_20] : memref<32x128xf32, #tpu.memory_space<vmem>>, vector<32x128xf32>
    tpu.vector_store %arg5[%c0_19, %c0_20], %19 {strides = array<i32>} : memref<32x128xf32, #tpu.memory_space<vmem>>, vector<32x128xf32>,
    %c0_i32_21 = arith.constant 0 : i32
    %21 = arith.cmpi eq, %arg1, %c0_i32_21 : i32
    %22 = arith.extui %21 : i1 to i32
    %c0_i32_22 = arith.constant 0 : i32
    %23 = arith.cmpi ne, %22, %c0_i32_22 : i32
    scf.if %23 {
      %c0_23 = arith.constant 0 : index
      %c0_24 = arith.constant 0 : index
      %24 = vector.load %arg4[%c0_23, %c0_24] : memref<32x128xf32, #tpu.memory_space<vmem>>, vector<32x128xf32>
      %cst = arith.constant dense<0.000000e+00> : vector<32xf32>
      %25 = vector.multi_reduction <add>, %24, %cst [1] : vector<32x128xf32> to vector<32xf32>
      %26 = vector.shape_cast %25 : vector<32xf32> to vector<32x1xf32>
      %c0_25 = arith.constant 0 : index
      %c0_26 = arith.constant 0 : index
      %c0_27 = arith.constant 0 : index
      %27 = vector.load %arg3[%c0_25, %c0_26, %c0_27] : memref<1x32x2xf32, #tpu.memory_space<vmem>>, vector<1x32x1xf32>
      %28 = vector.shape_cast %27 : vector<1x32x1xf32> to vector<32x1xf32>
      %29 = vector.shape_cast %26 : vector<32x1xf32> to vector<1x32x1xf32>
      tpu.vector_store %arg3[%c0_25, %c0_26, %c0_27], %29 {strides = array<i32>} : memref<1x32x2xf32, #tpu.memory_space<vmem>>, vector<1x32x1xf32>,
      %c0_28 = arith.constant 0 : index
      %c0_29 = arith.constant 0 : index
      %30 = vector.load %arg5[%c0_28, %c0_29] : memref<32x128xf32, #tpu.memory_space<vmem>>, vector<32x128xf32>
      %cst_30 = arith.constant dense<0.000000e+00> : vector<32xf32>
      %31 = vector.multi_reduction <add>, %30, %cst_30 [1] : vector<32x128xf32> to vector<32xf32>
      %32 = vector.shape_cast %31 : vector<32xf32> to vector<32x1xf32>
      %c0_31 = arith.constant 0 : index
      %c0_32 = arith.constant 0 : index
      %c1 = arith.constant 1 : index
      %33 = vector.load %arg3[%c0_31, %c0_32, %c1] : memref<1x32x2xf32, #tpu.memory_space<vmem>>, vector<1x32x1xf32>
      %34 = vector.shape_cast %33 : vector<1x32x1xf32> to vector<32x1xf32>
      %35 = vector.shape_cast %32 : vector<32x1xf32> to vector<1x32x1xf32>
      tpu.vector_store %arg3[%c0_31, %c0_32, %c1], %35 {strides = array<i32>} : memref<1x32x2xf32, #tpu.memory_space<vmem>>, vector<1x32x1xf32>,
    } else {
    }
    return
  }
  func.func @transform_0(%arg0: i32, %arg1: i32) -> (i32, i32, i32) {
    %c0_i32 = arith.constant 0 : i32
    %c0_i32_0 = arith.constant 0 : i32
    return %arg0, %c0_i32, %arg1 : i32, i32, i32
  }
  func.func @transform_1(%arg0: i32, %arg1: i32) -> (i32, i32, i32) {
    %c0_i32 = arith.constant 0 : i32
    %c0_i32_0 = arith.constant 0 : i32
    %c0_i32_1 = arith.constant 0 : i32
    return %arg0, %c0_i32, %c0_i32_0 : i32, i32, i32
  }
}

</mosaic_0001>

<bundles_post_ra>
// kernel: tpu_custom_call.1
= control target key start
LH: loop header
LB: loop body
LE: loop exit
PB: predicated region body
PF: predicated region fallthrough
CT: control target
= control target key end

     0   :  { %6 = vsyncpa [#allocation5], 0  ;;  %s601_s0 = inlined_call_operand.hbm [shape: f32[2,32,256], index: 0, kind: input, shape index: {}]   ;;  %s602_s1 = inlined_call_operand.vmem [shape: f32[2,32,2], index: 1, kind: output, shape index: {}]  }
   0x1   :  { %8 = vsyncpa [#allocation5 + $0x1], 0  ;;  %s513_s6 = smov 0   ;;  %s515_s7 = smov 0  }
   0x2   :  { %s517_s8 = smov 0   ;;  %s519_s9 = smov 0  }
   0x3   :  { %s521_s10 = smov 0   ;;  %s523_s11 = smov 0  }
   0x4 LB: > { %s347_s12 = sadd.s32 4294967295, %s499_s11   ;;  %s26_s13 = sadd.s32 1, %s495_s10  ;;  %s499_s11 = sphi %s523_s11, %s14_s11   ;;  %s495_s10 = sphi %s521_s10, %s609_s10   ;;  %s491_s9 = sphi %s519_s9, %s608_s9   ;;  %s487_s8 = sphi %s517_s8, %s607_s8   ;;  %s483_s7 = sphi %s515_s7, %s606_s7   ;;  %s479_s6 = sphi %s513_s6, %s605_s6  }
   0x5   : > { %p28_p0 = scmp.ge.s32.totalorder %s26_s13, 2  ;;  %s35_s14 = sadd.s32 1, %s487_s8 }
   0x6   : > { %p42_p1 = scmp.ne.s32.totalorder %s487_s8, %s483_s7  ;;  %p43_p2 = scmp.eq.s32.totalorder %s499_s11, 0 }
   0x7   : > { %s611_s13 = smov (%p28_p0, %s26_s13), 0  ;;  %p48_p4 = scmp.ne.s32.totalorder %s483_s7, %s479_s6 }
   0x8   : > { %p549_p3 = por %p43_p2, %p42_p1  ;;  %s30_s16 = ssub.s32 %s495_s10, %s611_s13 }
   0x9   : > { %p49_p5 = scmp.eq.s32.totalorder %s347_s12, 0  ;;  %p33_p6 = scmp.eq.s32.totalorder %s30_s16, 0 }
   0xa   : > { %p368_p8 = scmp.lt.s32.totalorder %s499_s11, 2  ;;  %s98_s19 = sand.u32 1, %s487_s8  }
   0xb   : > { %p556_p7 = por %p49_p5, %p48_p4  ;;  %s360_s20 = sshll.u32 %s495_s10, 6 }
   0xc   : > { %s562_s18 = scalar_select %p33_p6, %s487_s8, %s35_s14  }
   0xd   : > { %s351_s21 = sshll.u32 %s98_s19, 6  ;;  %s109_s24 = scalar_lea.hbm %s601_s0, %s360_s20 }
   0xe   : > { %s110_s25 = sshll.u32 %s109_s24, 4  ;;  %s102_s26 = scalar_lea.vmem [#allocation4], %s351_s21  ;;  %s111_s25 = int_to_ptr.hbm [resolvable:$true] %s110_s25 }
   0xf   : > { %s112_s27 = sshll.u32 %s102_s26, 4  ;;  %p365_p9 = pnand %p368_p8, %p549_p3  ;;  %s113_s27 = int_to_ptr.vmem [resolvable:$true] %s112_s27 }
  0x10   : > { %p354_p10 = scmp.ge.s32.totalorder %s499_s11, 1  ;;  %p120_p11 = scmp.lt.s32.totalorder %s499_s11, 3 }
  0x11   : > { %s99_s28 = scalar_lea.sflag [#allocation5], %s98_s19  ;;  %s501_s29 = smov 256  }
  0x12   : > { %s502_s30 = smov 16   ;;  %p121_p12 = pnand %p354_p10, %p120_p11 }
  0x13   : > { %367 = dma.hbm_to_vmem [thread:$0]  (!%p365_p9), %s111_s25, 1024, %s113_s27, %s99_s28, %s501_s29, %s501_s29, %s502_s30  }
  0x14   : > { %124 = sbr.rel (%p121_p12) target bundleno = 163 (0xa3), region = 24  ;;  %s126_s2 = sand.u32 (!%p121_p12), 1, %s483_s7  }
  0x15   : > { %s355_s3 = sshll.u32 (!%p121_p12), %s126_s2, 6  ;;  %s127_s4 = scalar_lea.sflag (!%p121_p12), [#allocation5], %s126_s2 }
  0x16   : > { %s130_s5 = scalar_lea.vmem (!%p121_p12), [#allocation4], %s355_s3 }
  0x19   : > { %474 = dma.done.wait (%p556_p7), %s127_s4, 1024  }
  0x1a   : > { %476 = vsyncadd (%p556_p7), %s127_s4, 4294966272  ;;  %v170_v0 = vld [vmem:[%s130_s5 + $0x20] sm:$0xff]  ;;  %v202_v1 = vld [vmem:[%s130_s5 + $0x28] sm:$0xff]  ;;  %p151_p13 = scmp.lt.s32.totalorder %s491_s9, 1  ;;  %vm247_vm0 = vcmask 7168   ;;  %vm264_vm1 = vcmask 15368  }
  0x1b   : > { %v168_v2 = vld [vmem:[%s130_s5] sm:$0xff]  ;;  %v210_v3 = vadd.f32 %v202_v1, %v170_v0  ;;  %v200_v4 = vld [vmem:[%s130_s5 + $0x8] sm:$0xff]  ;;  %v171_v8 = vld [vmem:[%s130_s5 + $0x30] sm:$0xff]  ;;  %v222_v20 = vmul.f32 %v202_v1, %v202_v1  ;;  %v190_v21 = vmul.f32 %v170_v0, %v170_v0 }
  0x1c   : > { %v188_v5 = vmul.f32 %v168_v2, %v168_v2  ;;  %v208_v6 = vadd.f32 %v200_v4, %v168_v2  ;;  %v220_v7 = vmul.f32 %v200_v4, %v200_v4  ;;  %v203_v9 = vld [vmem:[%s130_s5 + $0x38] sm:$0xff]  ;;  %v169_v11 = vld [vmem:[%s130_s5 + $0x10] sm:$0xff]  ;;  %v191_v18 = vmul.f32 %v171_v8, %v171_v8  ;;  %s613_s9 = smov (!%p151_p13, %s491_s9), 1 }
  0x1d   : > { %243 = vadd.xlane.f32.xlu1 %v210_v3  ;;  %v201_v12 = vld [vmem:[%s130_s5 + $0x18] sm:$0xff]  ;;  %v189_v13 = vmul.f32 %v169_v11, %v169_v11  ;;  %v211_v15 = vadd.f32 %v203_v9, %v171_v8  ;;  %v223_v19 = vmul.f32 %v203_v9, %v203_v9  ;;  %v226_v23 = vadd.f32 %v222_v20, %v190_v21  ;;  %s361_s6 = sshll.u32 %s613_s9, 5 }
  0x1e   : > { %239 = vadd.xlane.f32.xlu0 %v208_v6  ;;  %v224_v10 = vadd.f32 %v220_v7, %v188_v5  ;;  %v221_v14 = vmul.f32 %v201_v12, %v201_v12  ;;  %v209_v16 = vadd.f32 %v201_v12, %v169_v11  ;;  %s155_s15 = scalar_lea.vmem %s602_s1, %s361_s6 }
  0x1f   : > { %v227_v22 = vadd.f32 %v223_v19, %v191_v18 }
  0x20   : > { %256 = vadd.xlane.f32.xlu2 %v224_v10  ;;  %v225_v17 = vadd.f32 %v221_v14, %v189_v13 }
  0x25   : > { %245 = vadd.xlane.f32.xlu1 %v211_v15 }
  0x26   : > { %241 = vadd.xlane.f32.xlu0 %v209_v16 }
  0x28   : > { %258 = vadd.xlane.f32.xlu2 %v225_v17 }
  0x2d   : > { %262 = vadd.xlane.f32.xlu1 %v227_v22 }
  0x2e   : > { %260 = vadd.xlane.f32.xlu0 %v226_v23 }
  0x90   : > { %v244_v24 = vpop.xlane.xlu1 %243 }
  0x91   : > { %250 = vst.msk [vmem:[%s155_s15 + $0x10] sm:$0xff] %vm247_vm0, %v244_v24  ;;  %v240_v25 = vpop.xlane.xlu0 %239 }
  0x92   : > { %248 = vst.msk [vmem:[%s155_s15] sm:$0xff] %vm247_vm0, %v240_v25 }
  0x93   : > { %v257_v26 = vpop.xlane.xlu2 %256 }
  0x94   : > { %265 = vst.msk [vmem:[%s155_s15] sm:$0xff] %vm264_vm1, %v257_v26 }
  0x98   : > { %v246_v27 = vpop.xlane.xlu1 %245 }
  0x99   : > { %251 = vst.msk [vmem:[%s155_s15 + $0x18] sm:$0xff] %vm247_vm0, %v246_v27  ;;  %v242_v28 = vpop.xlane.xlu0 %241 }
  0x9a   : > { %249 = vst.msk [vmem:[%s155_s15 + $0x8] sm:$0xff] %vm247_vm0, %v242_v28 }
  0x9b   : > { %v259_v29 = vpop.xlane.xlu2 %258 }
  0x9c   : > { %266 = vst.msk [vmem:[%s155_s15 + $0x8] sm:$0xff] %vm264_vm1, %v259_v29 }
  0xa0   : > { %v263_v30 = vpop.xlane.xlu1 %262 }
  0xa1   : > { %268 = vst.msk [vmem:[%s155_s15 + $0x18] sm:$0xff] %vm264_vm1, %v263_v30  ;;  %v261_v31 = vpop.xlane.xlu0 %260 }
  0xa2   : > { %267 = vst.msk [vmem:[%s155_s15 + $0x10] sm:$0xff] %vm264_vm1, %v261_v31 }
  0xa3 PF: > { %s14_s11 = sadd.s32 1, %s499_s11   ;;  %s605_s6 = smov %s483_s7 }
  0xa4   : > { %p11_p0 = scmp.ge.s32.totalorder %s14_s11, 4   ;;  %s606_s7 = smov %s487_s8 }
  0xa5   : > { %s607_s8 = smov %s562_s18  ;;  %s608_s9 = smov %s495_s10 }
  0xa6   : > { %s609_s10 = smov %s611_s13  ;;  %13 = sbr.rel (!%p11_p0) target bundleno = 4 (0x4), region = 72 }
  0xab   :  { %290 = vsyncpa [#allocation5], 1 }
  0xac   :  { %292 = vsyncpa [#allocation5 + $0x1], 1 }

</bundles_post_ra>
